<compile_context>
chip_gen: v5e
topology: v5e:2x2
jax: 0.10.0
libtpu: 0.0.40
codegen_flags: <defaults>
</compile_context>

<pallas_src>
import functools

import jax
import jax.numpy as jnp
from jax.experimental import pallas as pl
from jax.experimental.pallas import tpu as pltpu

EPS = 1e-5  # nn.InstanceNorm2d default eps, affine=False, biased variance


def _residual_block_kernel(x_ref, w1_ref, w2_ref, o_ref, stack_ref, *, H, W, HW):
    # x_ref    : (Nb, Cp, HWp)  Nb images, channel-padded, lane-dense spatial axis
    # w1_ref   : (Cp, 9*Cp)     conv1 weight, w_cat[co, (ky*3+kx)*Cp + ci]
    # w2_ref   : (Cp, 9*Cp)     conv2 weight, same packing (bias dropped: IN cancels it)
    # o_ref    : (Nb, Cp, HWp)
    # stack_ref: (9*Cp, HWp)    VMEM scratch: 9 reflection-shifted operands stacked
    #                           along sublanes -> ONE MXU matmul per conv (K = 9*Cp)
    Nb, Cp, HWp = x_ref.shape

    w1 = w1_ref[...]
    w2 = w2_ref[...]

    # (1, HWp) edge masks; broadcast over sublanes inside jnp.where (free on the VPU).
    pcol = jax.lax.broadcasted_iota(jnp.int32, (1, HWp), 1)
    wcol = pcol % W
    row0 = pcol < W                 # h == 0
    rowL = pcol >= (H - 1) * W      # h == H-1 (and pad lanes; harmless, sliced off)
    col0 = wcol == 0                # w == 0
    colL = wcol == W - 1            # w == W-1
    lane_valid = None if HWp == HW else (pcol < HW)

    def conv3x3(a, w_cat):
        # a: (Cp, HWp) f32.  ReflectionPad2d(1) + 3x3 conv as a single matmul:
        # the 9 shifted operands are generated with pltpu.roll (XLU slot) + where
        # edge fix-ups (VPU) and written into the sublane-stacked scratch, then
        # contracted against the (Cp, 9*Cp) weight in one MXU matmul.
        # pltpu.roll matches jnp.roll: result[p] = a[(p - shift) mod HWp].
        rm = pltpu.roll(a, W, 1)             # a[h-1, w]  (wraps at h == 0)
        rp = pltpu.roll(a, HWp - W, 1)       # a[h+1, w]  (wraps at h == H-1 / pad)
        rows = (
            jnp.where(row0, rp, rm),         # dy = -1 : reflect -> a[1, w] at h == 0
            a,                               # dy =  0
            jnp.where(rowL, rm, rp),         # dy = +1 : reflect -> a[H-2, w] at h == H-1
        )
        for iy, ar in enumerate(rows):
            lm = pltpu.roll(ar, 1, 1)        # ar[h, w-1] (wraps at w == 0)
            lp = pltpu.roll(ar, HWp - 1, 1)  # ar[h, w+1] (wraps at w == W-1)
            base = iy * 3 * Cp
            stack_ref[pl.ds(base, Cp), :] = jnp.where(col0, lp, lm).astype(stack_ref.dtype)
            stack_ref[pl.ds(base + Cp, Cp), :] = ar.astype(stack_ref.dtype)
            stack_ref[pl.ds(base + 2 * Cp, Cp), :] = jnp.where(colL, lm, lp).astype(stack_ref.dtype)
        return jnp.dot(w_cat, stack_ref[...], preferred_element_type=jnp.float32)

    inv_hw = jnp.float32(1.0 / HW)

    def instance_norm(h):
        # Two-pass stats (mean, then centered sum of squares) to avoid the
        # E[x^2] - E[x]^2 cancellation; padded lanes masked out of both sums.
        # TODO(synk): for tiny Cp the lane reductions are XLU-bound; they could be
        # offloaded to the MXU via a dot with a ones column.
        hm = h if lane_valid is None else jnp.where(lane_valid, h, 0.0)
        m = jnp.sum(hm, axis=1, keepdims=True) * inv_hw
        d = h - m
        dm = d if lane_valid is None else jnp.where(lane_valid, d, 0.0)
        v = jnp.sum(dm * dm, axis=1, keepdims=True) * inv_hw
        return d * jax.lax.rsqrt(v + EPS)

    # fori_loop (not a Python unroll) so only one image's temporaries are live at
    # a time -> vreg/VMEM pressure independent of Nb.
    # TODO(synk): for the tiny-C regime, images could also be concatenated along
    # the lane axis to cut per-image roll/where issue count Nb-fold.
    def body(nb, carry):
        x = x_ref[nb].astype(jnp.float32)                     # (Cp, HWp)
        h = jnp.maximum(instance_norm(conv3x3(x, w1)), 0.0)   # conv1 -> IN -> ReLU
        h2 = instance_norm(conv3x3(h, w2))                    # conv2 -> IN (bias inert)
        o_ref[nb] = (x + h2).astype(o_ref.dtype)              # residual add
        return carry

    jax.lax.fori_loop(0, Nb, body, 0)


def _pack_weight(w, C, Cp, dtype):
    # OIHW (C, C, 3, 3) -> (Cp, 9*Cp), columns ordered [(ky*3+kx)*Cp + ci]
    wp = jnp.pad(w, ((0, Cp - C), (0, Cp - C), (0, 0), (0, 0)))
    return jnp.transpose(wp, (0, 2, 3, 1)).reshape(Cp, 9 * Cp).astype(dtype)


def _tpu_budget():
    """(scoped-VMEM budget bytes, #TensorCores) — conservative per generation."""
    kind = ""
    try:
        kind = jax.devices()[0].device_kind.lower()
    except Exception:
        pass
    if "v7" in kind or "7x" in kind:
        return 56 * 1024 * 1024, 2    # v7x: 64 MiB VMEM per TC, 2 TCs
    return 96 * 1024 * 1024, 1        # v5e/v6e: 128 MiB VMEM, 1 TC


def residual_block(x, w1, w2, b2=None, *, batch_block=None, matmul_dtype=jnp.float32):
    """x: (N, C, H, W); w1, w2: (C, C, 3, 3) OIHW; b2: (C,) or None. Needs H, W >= 2.

    b2 (conv2's bias) is accepted for interface parity with the PyTorch module but
    is NOT used: a per-channel constant feeding an affine-free InstanceNorm2d is
    cancelled exactly, so dropping it changes nothing in the result.
    """
    N, C, H, W = x.shape
    assert H >= 2 and W >= 2
    del b2
    HW = H * W
    HWp = ((HW + 127) // 128) * 128          # lane-dense minor dim
    Cp = ((max(C, 8) + 7) // 8) * 8          # f32 sublane multiple

    # Channel / spatial zero padding (mathematically inert; sliced off at the end).
    x_flat = jnp.pad(x, ((0, 0), (0, Cp - C), (0, 0), (0, 0))).reshape(N, Cp, HW)
    if HWp != HW:
        x_flat = jnp.pad(x_flat, ((0, 0), (0, 0), (0, HWp - HW)))
    w1m = _pack_weight(w1, C, Cp, matmul_dtype)
    w2m = _pack_weight(w2, C, Cp, matmul_dtype)

    # Generation-aware batch block: largest divisor of N whose double-buffered
    # pipeline footprint fits the VMEM budget; only require >= #TC grid steps when
    # the chip actually has more than one TensorCore.
    budget, num_tc = _tpu_budget()
    act_item = jnp.dtype(x.dtype).itemsize
    mm_item = jnp.dtype(matmul_dtype).itemsize
    per_img = Cp * HWp * act_item
    fixed = (9 * Cp * HWp * mm_item          # shifted-operand scratch
             + 2 * 2 * (Cp * 9 * Cp * mm_item)  # two weight packs, double-buffered
             + (4 << 20))                    # slack for temporaries / spills
    if batch_block is None:
        batch_block = 1
        for nb in range(N, 0, -1):
            if N % nb:
                continue
            if num_tc > 1 and (N // nb) < min(num_tc, N):
                continue
            if fixed + 4 * nb * per_img <= budget:   # 2 buffers x (in + out)
                batch_block = nb
                break
    Nb = batch_block
    assert N % Nb == 0

    out_flat = pl.pallas_call(
        functools.partial(_residual_block_kernel, H=H, W=W, HW=HW),
        out_shape=jax.ShapeDtypeStruct((N, Cp, HWp), x.dtype),
        grid_spec=pltpu.PrefetchScalarGridSpec(
            num_scalar_prefetch=0,
            grid=(N // Nb,),
            in_specs=[
                pl.BlockSpec((Nb, Cp, HWp), lambda n: (n, 0, 0)),
                # Constant-index weights (re-fetch is skipped between steps).
                # TODO(synk): single-buffer them (pipeline_mode=pl.Buffered(1)) for
                # extra VMEM headroom once that path is exercised in CI.
                pl.BlockSpec((Cp, 9 * Cp), lambda n: (0, 0)),
                pl.BlockSpec((Cp, 9 * Cp), lambda n: (0, 0)),
            ],
            out_specs=pl.BlockSpec((Nb, Cp, HWp), lambda n: (n, 0, 0)),
            scratch_shapes=[pltpu.VMEM((9 * Cp, HWp), matmul_dtype)],
        ),
        compiler_params=pltpu.CompilerParams(
            dimension_semantics=("parallel",),
            vmem_limit_bytes=int(budget),
        ),
    )(x_flat, w1m, w2m)

    return out_flat[:, :C, :HW].reshape(N, C, H, W)


def _reference(x, w1, w2, b2):
    """Pure-JAX reference mirroring the PyTorch module (bias kept, IN cancels it)."""
    def inorm(h):
        m = h.mean(axis=(2, 3), keepdims=True)
        v = ((h - m) ** 2).mean(axis=(2, 3), keepdims=True)
        return (h - m) / jnp.sqrt(v + EPS)

    dn = ('NCHW', 'OIHW', 'NCHW')
    xp = jnp.pad(x, ((0, 0), (0, 0), (1, 1), (1, 1)), mode='reflect')
    h = jax.lax.conv_general_dilated(xp, w1, (1, 1), 'VALID', dimension_numbers=dn)
    h = jax.nn.relu(inorm(h))
    hp = jnp.pad(h, ((0, 0), (0, 0), (1, 1), (1, 1)), mode='reflect')
    h2 = jax.lax.conv_general_dilated(hp, w2, (1, 1), 'VALID', dimension_numbers=dn)
    h2 = inorm(h2 + b2.reshape(1, -1, 1, 1))
    return x + h2


if __name__ == "__main__":
    # in_dim == out_dim is required by the residual add (as in the module).
    N, C, H, W = 4, 4, 16, 16
    key = jax.random.PRNGKey(0)
    kx, k1, k2, kb = jax.random.split(key, 4)

    x = jax.random.normal(kx, (N, C, H, W), dtype=jnp.float32)
    w1 = 0.2 * jax.random.normal(k1, (C, C, 3, 3), dtype=jnp.float32)
    w2 = 0.2 * jax.random.normal(k2, (C, C, 3, 3), dtype=jnp.float32)
    b2 = 0.1 * jax.random.normal(kb, (C,), dtype=jnp.float32)

    out = jax.block_until_ready(residual_block(x, w1, w2, b2))

    ref = _reference(x, w1, w2, b2)
    assert out.shape == (N, C, H, W)
    assert jnp.allclose(out, ref, atol=2e-4, rtol=2e-4), "mismatch vs reference"

    print("KERNEL_OK")
</pallas_src>

<mosaic_0001>
module attributes {stable_mosaic.version = 11 : i64} {
  func.func @_residual_block_kernel(%arg0: i32, %arg1: memref<4x8x256xf32, #tpu.memory_space<vmem>>, %arg2: memref<8x72xf32, #tpu.memory_space<vmem>>, %arg3: memref<8x72xf32, #tpu.memory_space<vmem>>, %arg4: memref<4x8x256xf32, #tpu.memory_space<vmem>>, %arg5: memref<72x256xf32, #tpu.memory_space<vmem>>) attributes {dimension_semantics = [#tpu.dimension_semantics<parallel>], iteration_bounds = array<i64: 1>, scalar_prefetch = 0 : i64, scratch_operands = 1 : i64, tpu.core_type = #tpu.core_type<tc>, window_params = [{transform_indices = @transform_0, window_bounds = array<i64: 4, 8, 256>}, {pipeline_mode = #tpu.pipeline_mode<synchronous>, transform_indices = @transform_1, window_bounds = array<i64: 8, 72>}, {pipeline_mode = #tpu.pipeline_mode<synchronous>, transform_indices = @transform_2, window_bounds = array<i64: 8, 72>}, {transform_indices = @transform_3, window_bounds = array<i64: 4, 8, 256>}]} {
    %c0 = arith.constant 0 : index
    %c0_0 = arith.constant 0 : index
    %0 = vector.load %arg2[%c0, %c0_0] : memref<8x72xf32, #tpu.memory_space<vmem>>, vector<8x72xf32>
    %c0_1 = arith.constant 0 : index
    %c0_2 = arith.constant 0 : index
    %1 = vector.load %arg3[%c0_1, %c0_2] : memref<8x72xf32, #tpu.memory_space<vmem>>, vector<8x72xf32>
    %2 = tpu.iota {dimensions = array<i32: 1>} : vector<1x256xi32>
    %c16_i32 = arith.constant 16 : i32
    %c0_i32 = arith.constant 0 : i32
    %3 = arith.cmpi eq, %c16_i32, %c0_i32 : i32
    %c1_i32 = arith.constant 1 : i32
    %4 = arith.select %3, %c1_i32, %c16_i32 : i32
    %5 = vector.broadcast %4 : i32 to vector<1x256xi32>
    %6 = arith.remsi %2, %5 : vector<1x256xi32>
    %c0_i32_3 = arith.constant 0 : i32
    %7 = vector.broadcast %c0_i32_3 : i32 to vector<1x256xi32>
    %8 = arith.cmpi ne, %6, %7 : vector<1x256xi32>
    %c0_i32_4 = arith.constant 0 : i32
    %9 = vector.broadcast %c0_i32_4 : i32 to vector<1x256xi32>
    %10 = arith.cmpi slt, %6, %9 : vector<1x256xi32>
    %c0_i32_5 = arith.constant 0 : i32
    %11 = arith.cmpi slt, %4, %c0_i32_5 : i32
    %12 = vector.broadcast %11 : i1 to vector<1x256xi1>
    %13 = vector.broadcast %12 : vector<1x256xi1> to vector<1x256xi1>
    %14 = arith.xori %10, %13 : vector<1x256xi1>
    %15 = arith.andi %14, %8 : vector<1x256xi1>
    %16 = vector.broadcast %4 : i32 to vector<1x256xi32>
    %17 = arith.addi %6, %16 : vector<1x256xi32>
    %18 = arith.select %15, %17, %6 : vector<1x256xi1>, vector<1x256xi32>
    %c16_i32_6 = arith.constant 16 : i32
    %19 = vector.broadcast %c16_i32_6 : i32 to vector<1x256xi32>
    %20 = arith.cmpi slt, %2, %19 : vector<1x256xi32>
    %c240_i32 = arith.constant 240 : i32
    %21 = vector.broadcast %c240_i32 : i32 to vector<1x256xi32>
    %22 = arith.cmpi sge, %2, %21 : vector<1x256xi32>
    %c0_i32_7 = arith.constant 0 : i32
    %23 = vector.broadcast %c0_i32_7 : i32 to vector<1x256xi32>
    %24 = arith.cmpi eq, %18, %23 : vector<1x256xi32>
    %c15_i32 = arith.constant 15 : i32
    %25 = vector.broadcast %c15_i32 : i32 to vector<1x256xi32>
    %26 = arith.cmpi eq, %18, %25 : vector<1x256xi32>
    %cst = arith.constant 3.906250e-03 : f32
    %c0_i32_8 = arith.constant 0 : i32
    %c4_i32 = arith.constant 4 : i32
    %27 = arith.addi %c0_i32_8, %c4_i32 : i32
    %c1_i32_9 = arith.constant 1 : i32
    scf.for %arg6 = %c0_i32_8 to %27 step %c1_i32_9  : i32 {
      %28 = arith.index_cast %arg6 : i32 to index
      %c0_11 = arith.constant 0 : index
      %c0_12 = arith.constant 0 : index
      %29 = vector.load %arg1[%28, %c0_11, %c0_12] : memref<4x8x256xf32, #tpu.memory_space<vmem>>, vector<1x8x256xf32>
      %30 = vector.shape_cast %29 : vector<1x8x256xf32> to vector<8x256xf32>
      %c16_i32_13 = arith.constant 16 : i32
      %31 = tpu.dynamic_rotate %30 by %c16_i32_13 dim 1 : vector<8x256xf32>, i32 -> vector<8x256xf32>
      %c240_i32_14 = arith.constant 240 : i32
      %32 = tpu.dynamic_rotate %30 by %c240_i32_14 dim 1 : vector<8x256xf32>, i32 -> vector<8x256xf32>
      %33 = vector.shape_cast %20 : vector<1x256xi1> to vector<1x256xi1>
      %34 = vector.broadcast %33 : vector<1x256xi1> to vector<8x256xi1>
      %35 = arith.select %34, %32, %31 : vector<8x256xi1>, vector<8x256xf32>
      %36 = vector.shape_cast %22 : vector<1x256xi1> to vector<1x256xi1>
      %37 = vector.broadcast %36 : vector<1x256xi1> to vector<8x256xi1>
      %38 = arith.select %37, %31, %32 : vector<8x256xi1>, vector<8x256xf32>
      %c1_i32_15 = arith.constant 1 : i32
      %39 = tpu.dynamic_rotate %35 by %c1_i32_15 dim 1 : vector<8x256xf32>, i32 -> vector<8x256xf32>
      %c255_i32 = arith.constant 255 : i32
      %40 = tpu.dynamic_rotate %35 by %c255_i32 dim 1 : vector<8x256xf32>, i32 -> vector<8x256xf32>
      %41 = vector.shape_cast %24 : vector<1x256xi1> to vector<1x256xi1>
      %42 = vector.broadcast %41 : vector<1x256xi1> to vector<8x256xi1>
      %43 = arith.select %42, %40, %39 : vector<8x256xi1>, vector<8x256xf32>
      %c0_16 = arith.constant 0 : index
      %c0_17 = arith.constant 0 : index
      %44 = vector.load %arg5[%c0_16, %c0_17] : memref<72x256xf32, #tpu.memory_space<vmem>>, vector<8x256xf32>
      tpu.vector_store %arg5[%c0_16, %c0_17], %43 {strides = array<i32>} : memref<72x256xf32, #tpu.memory_space<vmem>>, vector<8x256xf32>,
      %c8 = arith.constant 8 : index
      %c0_18 = arith.constant 0 : index
      %45 = vector.load %arg5[%c8, %c0_18] : memref<72x256xf32, #tpu.memory_space<vmem>>, vector<8x256xf32>
      tpu.vector_store %arg5[%c8, %c0_18], %35 {strides = array<i32>} : memref<72x256xf32, #tpu.memory_space<vmem>>, vector<8x256xf32>,
      %46 = vector.shape_cast %26 : vector<1x256xi1> to vector<1x256xi1>
      %47 = vector.broadcast %46 : vector<1x256xi1> to vector<8x256xi1>
      %48 = arith.select %47, %39, %40 : vector<8x256xi1>, vector<8x256xf32>
      %c16 = arith.constant 16 : index
      %c0_19 = arith.constant 0 : index
      %49 = vector.load %arg5[%c16, %c0_19] : memref<72x256xf32, #tpu.memory_space<vmem>>, vector<8x256xf32>
      tpu.vector_store %arg5[%c16, %c0_19], %48 {strides = array<i32>} : memref<72x256xf32, #tpu.memory_space<vmem>>, vector<8x256xf32>,
      %c1_i32_20 = arith.constant 1 : i32
      %50 = tpu.dynamic_rotate %30 by %c1_i32_20 dim 1 : vector<8x256xf32>, i32 -> vector<8x256xf32>
      %c255_i32_21 = arith.constant 255 : i32
      %51 = tpu.dynamic_rotate %30 by %c255_i32_21 dim 1 : vector<8x256xf32>, i32 -> vector<8x256xf32>
      %52 = vector.shape_cast %24 : vector<1x256xi1> to vector<1x256xi1>
      %53 = vector.broadcast %52 : vector<1x256xi1> to vector<8x256xi1>
      %54 = arith.select %53, %51, %50 : vector<8x256xi1>, vector<8x256xf32>
      %c24 = arith.constant 24 : index
      %c0_22 = arith.constant 0 : index
      %55 = vector.load %arg5[%c24, %c0_22] : memref<72x256xf32, #tpu.memory_space<vmem>>, vector<8x256xf32>
      tpu.vector_store %arg5[%c24, %c0_22], %54 {strides = array<i32>} : memref<72x256xf32, #tpu.memory_space<vmem>>, vector<8x256xf32>,
      %c32 = arith.constant 32 : index
      %c0_23 = arith.constant 0 : index
      %56 = vector.load %arg5[%c32, %c0_23] : memref<72x256xf32, #tpu.memory_space<vmem>>, vector<8x256xf32>
      tpu.vector_store %arg5[%c32, %c0_23], %30 {strides = array<i32>} : memref<72x256xf32, #tpu.memory_space<vmem>>, vector<8x256xf32>,
      %57 = vector.shape_cast %26 : vector<1x256xi1> to vector<1x256xi1>
      %58 = vector.broadcast %57 : vector<1x256xi1> to vector<8x256xi1>
      %59 = arith.select %58, %50, %51 : vector<8x256xi1>, vector<8x256xf32>
      %c40 = arith.constant 40 : index
      %c0_24 = arith.constant 0 : index
      %60 = vector.load %arg5[%c40, %c0_24] : memref<72x256xf32, #tpu.memory_space<vmem>>, vector<8x256xf32>
      tpu.vector_store %arg5[%c40, %c0_24], %59 {strides = array<i32>} : memref<72x256xf32, #tpu.memory_space<vmem>>, vector<8x256xf32>,
      %c1_i32_25 = arith.constant 1 : i32
      %61 = tpu.dynamic_rotate %38 by %c1_i32_25 dim 1 : vector<8x256xf32>, i32 -> vector<8x256xf32>
      %c255_i32_26 = arith.constant 255 : i32
      %62 = tpu.dynamic_rotate %38 by %c255_i32_26 dim 1 : vector<8x256xf32>, i32 -> vector<8x256xf32>
      %63 = vector.shape_cast %24 : vector<1x256xi1> to vector<1x256xi1>
      %64 = vector.broadcast %63 : vector<1x256xi1> to vector<8x256xi1>
      %65 = arith.select %64, %62, %61 : vector<8x256xi1>, vector<8x256xf32>
      %c48 = arith.constant 48 : index
      %c0_27 = arith.constant 0 : index
      %66 = vector.load %arg5[%c48, %c0_27] : memref<72x256xf32, #tpu.memory_space<vmem>>, vector<8x256xf32>
      tpu.vector_store %arg5[%c48, %c0_27], %65 {strides = array<i32>} : memref<72x256xf32, #tpu.memory_space<vmem>>, vector<8x256xf32>,
      %c56 = arith.constant 56 : index
      %c0_28 = arith.constant 0 : index
      %67 = vector.load %arg5[%c56, %c0_28] : memref<72x256xf32, #tpu.memory_space<vmem>>, vector<8x256xf32>
      tpu.vector_store %arg5[%c56, %c0_28], %38 {strides = array<i32>} : memref<72x256xf32, #tpu.memory_space<vmem>>, vector<8x256xf32>,
      %68 = vector.shape_cast %26 : vector<1x256xi1> to vector<1x256xi1>
      %69 = vector.broadcast %68 : vector<1x256xi1> to vector<8x256xi1>
      %70 = arith.select %69, %61, %62 : vector<8x256xi1>, vector<8x256xf32>
      %c64 = arith.constant 64 : index
      %c0_29 = arith.constant 0 : index
      %71 = vector.load %arg5[%c64, %c0_29] : memref<72x256xf32, #tpu.memory_space<vmem>>, vector<8x256xf32>
      tpu.vector_store %arg5[%c64, %c0_29], %70 {strides = array<i32>} : memref<72x256xf32, #tpu.memory_space<vmem>>, vector<8x256xf32>,
      %c0_30 = arith.constant 0 : index
      %c0_31 = arith.constant 0 : index
      %72 = vector.load %arg5[%c0_30, %c0_31] : memref<72x256xf32, #tpu.memory_space<vmem>>, vector<72x256xf32>
      %cst_32 = arith.constant dense<0.000000e+00> : vector<8x256xf32>
      %73 = tpu.matmul %0, %72, %cst_32 {dimension_numbers = #tpu.dot_dimension_numbers<[1], [0], [0], [1], [0, 0, 1, 1], [], []>} : vector<8x72xf32>, vector<72x256xf32>, vector<8x256xf32> -> vector<8x256xf32>
      %cst_33 = arith.constant dense<0.000000e+00> : vector<8xf32>
      %74 = vector.multi_reduction <add>, %73, %cst_33 [1] : vector<8x256xf32> to vector<8xf32>
      %75 = vector.shape_cast %74 : vector<8xf32> to vector<8x1xf32>
      %76 = vector.broadcast %cst : f32 to vector<8x1xf32>
      %77 = arith.mulf %75, %76 : vector<8x1xf32>
      %78 = vector.broadcast %77 : vector<8x1xf32> to vector<8x256xf32>
      %79 = arith.subf %73, %78 : vector<8x256xf32>
      %80 = arith.mulf %79, %79 : vector<8x256xf32>
      %cst_34 = arith.constant dense<0.000000e+00> : vector<8xf32>
      %81 = vector.multi_reduction <add>, %80, %cst_34 [1] : vector<8x256xf32> to vector<8xf32>
      %82 = vector.shape_cast %81 : vector<8xf32> to vector<8x1xf32>
      %83 = vector.broadcast %cst : f32 to vector<8x1xf32>
      %84 = arith.mulf %82, %83 : vector<8x1xf32>
      %cst_35 = arith.constant 9.99999974E-6 : f32
      %85 = vector.broadcast %cst_35 : f32 to vector<8x1xf32>
      %86 = arith.addf %84, %85 : vector<8x1xf32>
      %87 = math.rsqrt %86 : vector<8x1xf32>
      %88 = vector.broadcast %87 : vector<8x1xf32> to vector<8x256xf32>
      %89 = arith.mulf %79, %88 : vector<8x256xf32>
      %cst_36 = arith.constant 0.000000e+00 : f32
      %90 = vector.broadcast %cst_36 : f32 to vector<8x256xf32>
      %91 = arith.maximumf %89, %90 : vector<8x256xf32>
      %c16_i32_37 = arith.constant 16 : i32
      %92 = tpu.dynamic_rotate %91 by %c16_i32_37 dim 1 : vector<8x256xf32>, i32 -> vector<8x256xf32>
      %c240_i32_38 = arith.constant 240 : i32
      %93 = tpu.dynamic_rotate %91 by %c240_i32_38 dim 1 : vector<8x256xf32>, i32 -> vector<8x256xf32>
      %94 = vector.shape_cast %20 : vector<1x256xi1> to vector<1x256xi1>
      %95 = vector.broadcast %94 : vector<1x256xi1> to vector<8x256xi1>
      %96 = arith.select %95, %93, %92 : vector<8x256xi1>, vector<8x256xf32>
      %97 = vector.shape_cast %22 : vector<1x256xi1> to vector<1x256xi1>
      %98 = vector.broadcast %97 : vector<1x256xi1> to vector<8x256xi1>
      %99 = arith.select %98, %92, %93 : vector<8x256xi1>, vector<8x256xf32>
      %c1_i32_39 = arith.constant 1 : i32
      %100 = tpu.dynamic_rotate %96 by %c1_i32_39 dim 1 : vector<8x256xf32>, i32 -> vector<8x256xf32>
      %c255_i32_40 = arith.constant 255 : i32
      %101 = tpu.dynamic_rotate %96 by %c255_i32_40 dim 1 : vector<8x256xf32>, i32 -> vector<8x256xf32>
      %102 = vector.shape_cast %24 : vector<1x256xi1> to vector<1x256xi1>
      %103 = vector.broadcast %102 : vector<1x256xi1> to vector<8x256xi1>
      %104 = arith.select %103, %101, %100 : vector<8x256xi1>, vector<8x256xf32>
      %c0_41 = arith.constant 0 : index
      %c0_42 = arith.constant 0 : index
      %105 = vector.load %arg5[%c0_41, %c0_42] : memref<72x256xf32, #tpu.memory_space<vmem>>, vector<8x256xf32>
      tpu.vector_store %arg5[%c0_41, %c0_42], %104 {strides = array<i32>} : memref<72x256xf32, #tpu.memory_space<vmem>>, vector<8x256xf32>,
      %c8_43 = arith.constant 8 : index
      %c0_44 = arith.constant 0 : index
      %106 = vector.load %arg5[%c8_43, %c0_44] : memref<72x256xf32, #tpu.memory_space<vmem>>, vector<8x256xf32>
      tpu.vector_store %arg5[%c8_43, %c0_44], %96 {strides = array<i32>} : memref<72x256xf32, #tpu.memory_space<vmem>>, vector<8x256xf32>,
      %107 = vector.shape_cast %26 : vector<1x256xi1> to vector<1x256xi1>
      %108 = vector.broadcast %107 : vector<1x256xi1> to vector<8x256xi1>
      %109 = arith.select %108, %100, %101 : vector<8x256xi1>, vector<8x256xf32>
      %c16_45 = arith.constant 16 : index
      %c0_46 = arith.constant 0 : index
      %110 = vector.load %arg5[%c16_45, %c0_46] : memref<72x256xf32, #tpu.memory_space<vmem>>, vector<8x256xf32>
      tpu.vector_store %arg5[%c16_45, %c0_46], %109 {strides = array<i32>} : memref<72x256xf32, #tpu.memory_space<vmem>>, vector<8x256xf32>,
      %c1_i32_47 = arith.constant 1 : i32
      %111 = tpu.dynamic_rotate %91 by %c1_i32_47 dim 1 : vector<8x256xf32>, i32 -> vector<8x256xf32>
      %c255_i32_48 = arith.constant 255 : i32
      %112 = tpu.dynamic_rotate %91 by %c255_i32_48 dim 1 : vector<8x256xf32>, i32 -> vector<8x256xf32>
      %113 = vector.shape_cast %24 : vector<1x256xi1> to vector<1x256xi1>
      %114 = vector.broadcast %113 : vector<1x256xi1> to vector<8x256xi1>
      %115 = arith.select %114, %112, %111 : vector<8x256xi1>, vector<8x256xf32>
      %c24_49 = arith.constant 24 : index
      %c0_50 = arith.constant 0 : index
      %116 = vector.load %arg5[%c24_49, %c0_50] : memref<72x256xf32, #tpu.memory_space<vmem>>, vector<8x256xf32>
      tpu.vector_store %arg5[%c24_49, %c0_50], %115 {strides = array<i32>} : memref<72x256xf32, #tpu.memory_space<vmem>>, vector<8x256xf32>,
      %c32_51 = arith.constant 32 : index
      %c0_52 = arith.constant 0 : index
      %117 = vector.load %arg5[%c32_51, %c0_52] : memref<72x256xf32, #tpu.memory_space<vmem>>, vector<8x256xf32>
      tpu.vector_store %arg5[%c32_51, %c0_52], %91 {strides = array<i32>} : memref<72x256xf32, #tpu.memory_space<vmem>>, vector<8x256xf32>,
      %118 = vector.shape_cast %26 : vector<1x256xi1> to vector<1x256xi1>
      %119 = vector.broadcast %118 : vector<1x256xi1> to vector<8x256xi1>
      %120 = arith.select %119, %111, %112 : vector<8x256xi1>, vector<8x256xf32>
      %c40_53 = arith.constant 40 : index
      %c0_54 = arith.constant 0 : index
      %121 = vector.load %arg5[%c40_53, %c0_54] : memref<72x256xf32, #tpu.memory_space<vmem>>, vector<8x256xf32>
      tpu.vector_store %arg5[%c40_53, %c0_54], %120 {strides = array<i32>} : memref<72x256xf32, #tpu.memory_space<vmem>>, vector<8x256xf32>,
      %c1_i32_55 = arith.constant 1 : i32
      %122 = tpu.dynamic_rotate %99 by %c1_i32_55 dim 1 : vector<8x256xf32>, i32 -> vector<8x256xf32>
      %c255_i32_56 = arith.constant 255 : i32
      %123 = tpu.dynamic_rotate %99 by %c255_i32_56 dim 1 : vector<8x256xf32>, i32 -> vector<8x256xf32>
      %124 = vector.shape_cast %24 : vector<1x256xi1> to vector<1x256xi1>
      %125 = vector.broadcast %124 : vector<1x256xi1> to vector<8x256xi1>
      %126 = arith.select %125, %123, %122 : vector<8x256xi1>, vector<8x256xf32>
      %c48_57 = arith.constant 48 : index
      %c0_58 = arith.constant 0 : index
      %127 = vector.load %arg5[%c48_57, %c0_58] : memref<72x256xf32, #tpu.memory_space<vmem>>, vector<8x256xf32>
      tpu.vector_store %arg5[%c48_57, %c0_58], %126 {strides = array<i32>} : memref<72x256xf32, #tpu.memory_space<vmem>>, vector<8x256xf32>,
      %c56_59 = arith.constant 56 : index
      %c0_60 = arith.constant 0 : index
      %128 = vector.load %arg5[%c56_59, %c0_60] : memref<72x256xf32, #tpu.memory_space<vmem>>, vector<8x256xf32>
      tpu.vector_store %arg5[%c56_59, %c0_60], %99 {strides = array<i32>} : memref<72x256xf32, #tpu.memory_space<vmem>>, vector<8x256xf32>,
      %129 = vector.shape_cast %26 : vector<1x256xi1> to vector<1x256xi1>
      %130 = vector.broadcast %129 : vector<1x256xi1> to vector<8x256xi1>
      %131 = arith.select %130, %122, %123 : vector<8x256xi1>, vector<8x256xf32>
      %c64_61 = arith.constant 64 : index
      %c0_62 = arith.constant 0 : index
      %132 = vector.load %arg5[%c64_61, %c0_62] : memref<72x256xf32, #tpu.memory_space<vmem>>, vector<8x256xf32>
      tpu.vector_store %arg5[%c64_61, %c0_62], %131 {strides = array<i32>} : memref<72x256xf32, #tpu.memory_space<vmem>>, vector<8x256xf32>,
      %c0_63 = arith.constant 0 : index
      %c0_64 = arith.constant 0 : index
      %133 = vector.load %arg5[%c0_63, %c0_64] : memref<72x256xf32, #tpu.memory_space<vmem>>, vector<72x256xf32>
      %cst_65 = arith.constant dense<0.000000e+00> : vector<8x256xf32>
      %134 = tpu.matmul %1, %133, %cst_65 {dimension_numbers = #tpu.dot_dimension_numbers<[1], [0], [0], [1], [0, 0, 1, 1], [], []>} : vector<8x72xf32>, vector<72x256xf32>, vector<8x256xf32> -> vector<8x256xf32>
      %cst_66 = arith.constant dense<0.000000e+00> : vector<8xf32>
      %135 = vector.multi_reduction <add>, %134, %cst_66 [1] : vector<8x256xf32> to vector<8xf32>
      %136 = vector.shape_cast %135 : vector<8xf32> to vector<8x1xf32>
      %137 = vector.broadcast %cst : f32 to vector<8x1xf32>
      %138 = arith.mulf %136, %137 : vector<8x1xf32>
      %139 = vector.broadcast %138 : vector<8x1xf32> to vector<8x256xf32>
      %140 = arith.subf %134, %139 : vector<8x256xf32>
      %141 = arith.mulf %140, %140 : vector<8x256xf32>
      %cst_67 = arith.constant dense<0.000000e+00> : vector<8xf32>
      %142 = vector.multi_reduction <add>, %141, %cst_67 [1] : vector<8x256xf32> to vector<8xf32>
      %143 = vector.shape_cast %142 : vector<8xf32> to vector<8x1xf32>
      %144 = vector.broadcast %cst : f32 to vector<8x1xf32>
      %145 = arith.mulf %143, %144 : vector<8x1xf32>
      %cst_68 = arith.constant 9.99999974E-6 : f32
      %146 = vector.broadcast %cst_68 : f32 to vector<8x1xf32>
      %147 = arith.addf %145, %146 : vector<8x1xf32>
      %148 = math.rsqrt %147 : vector<8x1xf32>
      %149 = vector.broadcast %148 : vector<8x1xf32> to vector<8x256xf32>
      %150 = arith.mulf %140, %149 : vector<8x256xf32>
      %151 = arith.addf %30, %150 : vector<8x256xf32>
      %152 = arith.index_cast %arg6 : i32 to index
      %c0_69 = arith.constant 0 : index
      %c0_70 = arith.constant 0 : index
      %153 = vector.load %arg4[%152, %c0_69, %c0_70] : memref<4x8x256xf32, #tpu.memory_space<vmem>>, vector<1x8x256xf32>
      %154 = vector.shape_cast %153 : vector<1x8x256xf32> to vector<8x256xf32>
      %155 = vector.shape_cast %151 : vector<8x256xf32> to vector<1x8x256xf32>
      tpu.vector_store %arg4[%152, %c0_69, %c0_70], %155 {strides = array<i32>} : memref<4x8x256xf32, #tpu.memory_space<vmem>>, vector<1x8x256xf32>,
    }
    %c4_i32_10 = arith.constant 4 : i32
    return
  }
  func.func @transform_0(%arg0: i32) -> (i32, i32, i32) {
    %c0_i32 = arith.constant 0 : i32
    %c0_i32_0 = arith.constant 0 : i32
    %c0_i32_1 = arith.constant 0 : i32
    return %arg0, %c0_i32, %c0_i32_0 : i32, i32, i32
  }
  func.func @transform_1(%arg0: i32) -> (i32, i32) {
    %c0_i32 = arith.constant 0 : i32
    %c0_i32_0 = arith.constant 0 : i32
    %c0_i32_1 = arith.constant 0 : i32
    return %c0_i32, %c0_i32_0 : i32, i32
  }
  func.func @transform_2(%arg0: i32) -> (i32, i32) {
    %c0_i32 = arith.constant 0 : i32
    %c0_i32_0 = arith.constant 0 : i32
    %c0_i32_1 = arith.constant 0 : i32
    return %c0_i32, %c0_i32_0 : i32, i32
  }
  func.func @transform_3(%arg0: i32) -> (i32, i32, i32) {
    %c0_i32 = arith.constant 0 : i32
    %c0_i32_0 = arith.constant 0 : i32
    %c0_i32_1 = arith.constant 0 : i32
    return %arg0, %c0_i32, %c0_i32_0 : i32, i32, i32
  }
}

</mosaic_0001>

<bundles_post_ra>
// kernel: tpu_custom_call.1
= control target key start
LH: loop header
LB: loop body
LE: loop exit
PB: predicated region body
PF: predicated region fallthrough
CT: control target
= control target key end

     0   :  { %8 = vsyncpa [#allocation4], 0  ;;  %s987_s0 = inlined_call_operand.hbm [shape: f32[4,8,256], index: 0, kind: input, shape index: {}]   ;;  %s988_s1 = inlined_call_operand.hbm [shape: f32[8,72], index: 1, kind: input, shape index: {}]   ;;  %s989_s2 = inlined_call_operand.hbm [shape: f32[8,72], index: 2, kind: input, shape index: {}]   ;;  %s990_s3 = inlined_call_operand.hbm [shape: f32[4,8,256], index: 3, kind: output, shape index: {}]  }
   0x1   :  { %9 = vsyncpa [#allocation7], 0  ;;  %s29_s14 = sshll.u32 %s988_s1, 4  ;;  %s30_s14 = int_to_ptr.hbm [resolvable:$true] %s29_s14 }
   0x2   :  { %10 = vsyncpa [#allocation5], 0  ;;  %s720_s15 = smov [#allocation6]   ;;  %s15_s19 = sshll.u32 %s987_s0, 4  ;;  %s16_s19 = int_to_ptr.hbm [resolvable:$true] %s15_s19 }
   0x3   :  { %s31_s16 = sshll.u32 %s720_s15, 4  ;;  %s721_s20 = smov [#allocation3]   ;;  %s32_s16 = int_to_ptr.vmem [resolvable:$true] %s31_s16 }
   0x4   :  { %34 = dma.hbm_to_vmem [thread:$0]  %s30_s14, 128, %s32_s16, [#allocation7]  }
   0x5   :  { %s17_s21 = sshll.u32 %s721_s20, 4  ;;  %s722_s22 = smov 256   ;;  %s18_s21 = int_to_ptr.vmem [resolvable:$true] %s17_s21 }
   0x6   :  { %s723_s23 = smov 16   ;;  %s40_s25 = sshll.u32 %s989_s2, 4  ;;  %s41_s25 = int_to_ptr.hbm [resolvable:$true] %s40_s25 }
   0x7   :  { %23 = dma.hbm_to_vmem [thread:$0]  %s16_s19, 1024, %s18_s21, [#allocation4], %s722_s22, %s722_s22, %s723_s23  }
   0x8   :  { %s724_s26 = smov [#allocation8]  }
   0x9   :  { %s42_s27 = sshll.u32 %s724_s26, 4  ;;  %s43_s27 = int_to_ptr.vmem [resolvable:$true] %s42_s27 }
   0xa   :  { %45 = dma.hbm_to_vmem [thread:$0]  %s41_s25, 128, %s43_s27, [#allocation7]  }
   0xb   :  { %710 = dma.done.wait [#allocation4], 1024  }
   0xc   :  { %711 = vsyncadd [#allocation4], 4294966272 }
   0xd   :  { %712 = dma.done.wait [#allocation7], 256  }
   0xe   :  { %713 = vsyncadd [#allocation7], 4294967040  ;;  %v60_v0 = vlaneseq  ;;  %v779_v7 = vld [vmem:[#allocation6] sm:$0xff]  ;;  %v781_v8 = vld [vmem:[#allocation8] sm:$0xff]  ;;  %s791_s0 = smov 0  }
  0x10   :  { %v762_v1 = vand.u32 127, %v60_v0 }
  0x12   :  { %v765_v2 = vadd.s32 128, %v762_v1  ;;  %v67_v3 = vand.u32 15, %v762_v1  ;;  %vm87_vm0 = vcmp.lt.s32.totalorder %v762_v1, 16 }
  0x14   :  { %v74_v4 = vand.u32 15, %v765_v2  ;;  %vm90_vm1 = vcmp.ge.s32.totalorder %v765_v2, 240  ;;  %vm771_vm2 = vcmp.eq.s32.totalorder %v67_v3, 0  ;;  %vm775_vm3 = vcmp.eq.s32.totalorder %v67_v3, 15 }
  0x16   :  { %vm783_vm4 = vcmp.eq.s32.totalorder %v74_v4, 0  ;;  %vm787_vm5 = vcmp.eq.s32.totalorder %v74_v4, 15 }
  0x17 LB: > { %s506_s2 = sshll.u32 %s718_s0, 4  ;;  %s725_s29 = smov 16   ;;  %vm116_vm6 = vcmp.lt.s32.totalorder %v762_v1, 112  ;;  %vm135_vm7 = vcmp.lt.s32.totalorder %v762_v1, 1  ;;  %vm142_vm8 = vcmp.lt.s32.totalorder %v762_v1, 127  ;;  %vm225_vm9 = vcmask 588800   ;;  %s718_s0 = sphi %s791_s0, %s100_s0  }
  0x18   : > { %s103_s28 = scalar_lea.vmem [#allocation3], %s506_s2  ;;  %s726_s30 = smov 112  }
  0x19   : > { %v799_v11 = vld [vmem:[%s103_s28] sm:$0xff]  ;;  %v801_v12 = vld [vmem:[%s103_s28 + $0x8] sm:$0xff]  ;;  %s727_s4 = smov 1   ;;  %s728_s5 = smov 127  }
  0x1a   : > { %v526_v13 = vpack.i.bf16 %v801_v12, %v799_v11  ;;  %s467_s6 = scalar_lea.vmem [#allocation9], %s506_s2  ;;  %s100_s0 = sadd.s32 1, %s718_s0  }
  0x1b   : > { %p97_p0 = scmp.ge.s32.totalorder %s100_s0, 4  }
  0x1c   : > { %527 = vrot.lane.b32.xlu0 %v526_v13, %s725_s29  ;;  %547 = vrot.lane.b32.xlu2 %v526_v13, %s727_s4  ;;  %s476_s9 = sshll.u32 (%p97_p0), %s990_s3, 4  ;;  %s729_s10 = smov (%p97_p0), [#allocation9]   ;;  %s477_s9 = int_to_ptr.hbm [resolvable:$true] %s476_s9 }
  0x1d   :  { %s474_s11 = sshll.u32 (%p97_p0), %s729_s10, 4  ;;  %s475_s11 = int_to_ptr.vmem [resolvable:$true] %s474_s11 }
  0x24   : > { %532 = vrot.lane.b32.xlu0 %v526_v13, %s726_s30  ;;  %552 = vrot.lane.b32.xlu2 %v526_v13, %s728_s5 }
  0x76   : > { %v548_v28 = vpop.permute.xlu2 %547 }
  0x77   : > { %v550_v34 = vunpack.i.h.bf16 %v548_v28  ;;  %v549_v37 = vunpack.i.l.bf16 %v548_v28 }
  0x79   : > { %v168_v46 = vsel %vm135_vm7, %v550_v34, %v549_v37  ;;  %v167_v48 = vsel %vm135_vm7, %v549_v37, %v550_v34 }
  0x7e   : > { %v553_v32 = vpop.permute.xlu2 %552 }
  0x7f   : > { %v555_v38 = vunpack.i.h.bf16 %v553_v32  ;;  %v554_v39 = vunpack.i.l.bf16 %v553_v32 }
  0x81   : > { %v173_v47 = vsel %vm142_vm8, %v554_v39, %v555_v38  ;;  %v174_v49 = vsel %vm142_vm8, %v555_v38, %v554_v39 }
  0x82   : > { %v181_v56 = vsel %vm775_vm3, %v168_v46, %v173_v47  ;;  %v182_v57 = vsel %vm787_vm5, %v167_v48, %v174_v49  ;;  %v175_v62 = vsel %vm771_vm2, %v173_v47, %v168_v46  ;;  %v176_v63 = vsel %vm783_vm4, %v174_v49, %v167_v48 }
  0x8e   : > { %v528_v14 = vpop.permute.xlu0 %527 }
  0x8f   : > { %v530_v15 = vunpack.i.h.bf16 %v528_v14  ;;  %v529_v16 = vunpack.i.l.bf16 %v528_v14 }
  0x91   : > { %v812_v20 = vsel %vm87_vm0, %v529_v16, %v530_v15  ;;  %v111_v21 = vsel %vm87_vm0, %v530_v15, %v529_v16 }
  0x96   : > { %v533_v17 = vpop.permute.xlu0 %532 }
  0x97   : > { %v535_v18 = vunpack.i.h.bf16 %v533_v17  ;;  %v534_v19 = vunpack.i.l.bf16 %v533_v17 }
  0x99   : > { %v117_v22 = vsel %vm116_vm6, %v534_v19, %v535_v18  ;;  %v118_v23 = vsel %vm116_vm6, %v535_v18, %v534_v19 }
  0x9a   : > { %v822_v24 = vsel %vm87_vm0, %v117_v22, %v111_v21  ;;  %v130_v25 = vsel %vm90_vm1, %v812_v20, %v118_v23 }
  0x9b   : > { %v556_v26 = vpack.i.bf16 %v812_v20, %v822_v24  ;;  %v536_v27 = vpack.i.bf16 %v130_v25, %v117_v22 }
  0x9d   : > { %557 = vrot.lane.b32.xlu0 %v556_v26, %s727_s4  ;;  %537 = vrot.lane.b32.xlu1 %v536_v27, %s727_s4 }
  0xa5   : > { %542 = vrot.lane.b32.xlu1 %v536_v27, %s728_s5 }
  0xad   : > { %562 = vrot.lane.b32.xlu1 %v556_v26, %s728_s5 }
 0x10f   : > { %v538_v29 = vpop.permute.xlu1 %537  ;;  %v558_v50 = vpop.permute.xlu0 %557 }
 0x110   : > { %v540_v30 = vunpack.i.h.bf16 %v538_v29  ;;  %v539_v31 = vunpack.i.l.bf16 %v538_v29  ;;  %v560_v58 = vunpack.i.h.bf16 %v558_v50  ;;  %v559_v59 = vunpack.i.l.bf16 %v558_v50 }
 0x112   : > { %v190_v40 = vsel %vm135_vm7, %v540_v30, %v539_v31  ;;  %v189_v42 = vsel %vm135_vm7, %v539_v31, %v540_v30  ;;  %v137_v0 = vsel %vm135_vm7, %v560_v58, %v559_v59  ;;  %v136_v3 = vsel %vm135_vm7, %v559_v59, %v560_v58 }
 0x117   : > { %v543_v33 = vpop.permute.xlu1 %542 }
 0x118   : > { %v545_v35 = vunpack.i.h.bf16 %v543_v33  ;;  %v544_v36 = vunpack.i.l.bf16 %v543_v33 }
 0x11a   : > { %v195_v41 = vsel %vm142_vm8, %v544_v36, %v545_v35  ;;  %v196_v43 = vsel %vm142_vm8, %v545_v35, %v544_v36 }
 0x11b   : > { %v203_v44 = vsel %vm775_vm3, %v190_v40, %v195_v41  ;;  %v204_v45 = vsel %vm787_vm5, %v189_v42, %v196_v43  ;;  %v197_v52 = vsel %vm771_vm2, %v195_v41, %v190_v40  ;;  %v198_v53 = vsel %vm783_vm4, %v196_v43, %v189_v42 }
 0x11c   : > { %236 = vmatpush.msra.mxu0 %v203_v44  ;;  %256 = vmatpush.msra.mxu1 %v204_v45 }
 0x11e   : > { %237 = vmatpush.msra.mxu0 %v117_v22  ;;  %257 = vmatpush.msra.mxu1 %v130_v25 }
 0x11f   : > { %v563_v51 = vpop.permute.xlu1 %562 }
 0x120   : > { %v565_v54 = vunpack.i.h.bf16 %v563_v51  ;;  %v564_v55 = vunpack.i.l.bf16 %v563_v51  ;;  %238 = vmatpush.msra.mxu0 %v197_v52  ;;  %258 = vmatpush.msra.mxu1 %v198_v53 }
 0x122   : > { %239 = vmatpush.msra.mxu0 %v181_v56  ;;  %259 = vmatpush.msra.mxu1 %v182_v57  ;;  %v143_v60 = vsel %vm142_vm8, %v564_v55, %v565_v54  ;;  %v144_v61 = vsel %vm142_vm8, %v565_v54, %v564_v55 }
 0x123   : > { %v159_v4 = vsel %vm775_vm3, %v137_v0, %v143_v60  ;;  %v160_v13 = vsel %vm787_vm5, %v136_v3, %v144_v61  ;;  %v149_v14 = vsel %vm771_vm2, %v143_v60, %v137_v0  ;;  %v150_v15 = vsel %vm783_vm4, %v144_v61, %v136_v3 }
 0x124   : > { %240 = vmatpush.msra.mxu0 %v799_v11  ;;  %260 = vmatpush.msra.mxu1 %v801_v12 }
 0x126   : > { %241 = vmatpush.msra.mxu0 %v175_v62  ;;  %261 = vmatpush.msra.mxu1 %v176_v63 }
 0x128   : > { %242 = vmatpush.msra.mxu0 %v159_v4  ;;  %262 = vmatpush.msra.mxu1 %v160_v13 }
 0x12a   : > { %243 = vmatpush.msra.mxu0 %v822_v24  ;;  %263 = vmatpush.msra.mxu1 %v812_v20 }
 0x12c   : > { %244 = vmatpush.msra.mxu0 %v149_v14  ;;  %264 = vmatpush.msra.mxu1 %v150_v15 }
 0x12d   : > { %501 = vmatmul.msk.f32.vlgmr.msra.gmra.mxu0 %vm225_vm9, %v779_v7  ;;  %502 = vmatmul.msk.f32.vlgmr.msra.gmra.mxu1 %vm225_vm9, %v779_v7 }
 0x1aa   : > { %v246_v16 = vpop.f32.mrf.mxu0  ;;  %v266_v17 = vpop.f32.mrf.mxu1 }
 0x1ab   : > { %v269_v18 = vadd.f32 %v266_v17, %v246_v16 }
 0x1ad   : > { %270 = vadd.xlane.f32.xlu2 %v269_v18 }
 0x220   : > { %v271_v19 = vpop.xlane.xlu2 %270 }
 0x221   : > { %v272_v20 = vmul.f32 0.00390625, %v271_v19 }
 0x223   : > { %v273_v21 = vsub.f32 %v246_v16, %v272_v20  ;;  %v274_v22 = vsub.f32 %v266_v17, %v272_v20 }
 0x225   : > { %v275_v23 = vmul.f32 %v273_v21, %v273_v21  ;;  %v276_v24 = vmul.f32 %v274_v22, %v274_v22 }
 0x227   : > { %v277_v25 = vadd.f32 %v276_v24, %v275_v23 }
 0x229   : > { %278 = vadd.xlane.f32.xlu0 %v277_v25 }
 0x29c   : > { %v279_v26 = vpop.xlane.xlu0 %278 }
 0x29d   : > { %v280_v27 = vmul.f32 0.00390625, %v279_v26 }
 0x29f   : > { %v281_v28 = vadd.f32 1e-05, %v280_v27 }
 0x2a1   : > { %606 = vrsqrt.f32 %v281_v28  ;;  %vm288_vm11 = vweird.f32 %v281_v28 }
 0x2a7   : > { %v607_v29 = vpop.eup %606 }
 0x2a8   : > { %v283_v30 = vmul.f32 %v607_v29, %v281_v28  ;;  %vm289_vm10 = vweird.f32 %v607_v29 }
 0x2a9   : > { %vm290_vm12 = vmor %vm288_vm11, %vm289_vm10 }
 0x2aa   : > { %v284_v31 = vmul.f32 %v607_v29, %v283_v30 }
 0x2ac   : > { %v285_v32 = vmul.f32 0.5, %v284_v31 }
 0x2ae   : > { %v286_v33 = vsub.f32 1.5, %v285_v32 }
 0x2b0   : > { %v287_v34 = vmul.f32 %v607_v29, %v286_v33 }
 0x2b2   : > { %v291_v35 = vsel %vm290_vm12, %v607_v29, %v287_v34 }
 0x2b3   : > { %v891_v36 = vmul.f32 %v291_v35, %v273_v21  ;;  %v893_v37 = vmul.f32 %v291_v35, %v274_v22 }
 0x2b5   : > { %v294_v38 = vmax.f32 %v891_v36, 0.0  ;;  %v295_v39 = vmax.f32 %v893_v37, 0.0 }
 0x2b7   : > { %v591_v40 = vpack.i.bf16 %v295_v39, %v294_v38 }
 0x2b9   : > { %592 = vrot.lane.b32.xlu2 %v591_v40, %s728_s5  ;;  %567 = vrot.lane.b32.xlu1 %v591_v40, %s725_s29 }
 0x2c1   : > { %572 = vrot.lane.b32.xlu1 %v591_v40, %s726_s30 }
 0x313   : > { %v593_v3 = vpop.permute.xlu2 %592 }
 0x314   : > { %v595_v14 = vunpack.i.h.bf16 %v593_v3  ;;  %v594_v15 = vunpack.i.l.bf16 %v593_v3 }
 0x316   : > { %v344_v22 = vsel %vm142_vm8, %v594_v15, %v595_v14  ;;  %v345_v24 = vsel %vm142_vm8, %v595_v14, %v594_v15 }
 0x32b   : > { %v568_v41 = vpop.permute.xlu1 %567 }
 0x32c   : > { %v570_v42 = vunpack.i.h.bf16 %v568_v41  ;;  %v569_v43 = vunpack.i.l.bf16 %v568_v41 }
 0x32e   : > { %v902_v47 = vsel %vm87_vm0, %v569_v43, %v570_v42  ;;  %v301_v48 = vsel %vm87_vm0, %v570_v42, %v569_v43 }
 0x333   : > { %v573_v44 = vpop.permute.xlu1 %572 }
 0x334   : > { %v575_v45 = vunpack.i.h.bf16 %v573_v44  ;;  %v574_v46 = vunpack.i.l.bf16 %v573_v44 }
 0x336   : > { %v306_v49 = vsel %vm116_vm6, %v574_v46, %v575_v45  ;;  %v307_v50 = vsel %vm116_vm6, %v575_v45, %v574_v46 }
 0x337   : > { %v308_v51 = vsel %vm87_vm0, %v306_v49, %v301_v48  ;;  %v311_v52 = vsel %vm90_vm1, %v902_v47, %v307_v50 }
 0x338   : > { %v601_v53 = vpack.i.bf16 %v902_v47, %v308_v51  ;;  %v576_v54 = vpack.i.bf16 %v311_v52, %v306_v49 }
 0x33a   : > { %602 = vrot.lane.b32.xlu0 %v601_v53, %s728_s5  ;;  %577 = vrot.lane.b32.xlu1 %v576_v54, %s727_s4 }
 0x342   : > { %582 = vrot.lane.b32.xlu1 %v576_v54, %s728_s5 }
 0x34a   : > { %587 = vrot.lane.b32.xlu1 %v591_v40, %s727_s4 }
 0x352   : > { %597 = vrot.lane.b32.xlu1 %v601_v53, %s727_s4 }
 0x3ac   : > { %v578_v55 = vpop.permute.xlu1 %577  ;;  %v603_v25 = vpop.permute.xlu0 %602 }
 0x3ad   : > { %v580_v56 = vunpack.i.h.bf16 %v578_v55  ;;  %v579_v57 = vunpack.i.l.bf16 %v578_v55  ;;  %v605_v28 = vunpack.i.h.bf16 %v603_v25  ;;  %v604_v29 = vunpack.i.l.bf16 %v603_v25 }
 0x3af   : > { %v361_v61 = vsel %vm135_vm7, %v580_v56, %v579_v57  ;;  %v360_v63 = vsel %vm135_vm7, %v579_v57, %v580_v56  ;;  %v322_v36 = vsel %vm142_vm8, %v604_v29, %v605_v28 }
 0x3b4   : > { %v583_v58 = vpop.permute.xlu1 %582 }
 0x3b5   : > { %v585_v59 = vunpack.i.h.bf16 %v583_v58  ;;  %v584_v60 = vunpack.i.l.bf16 %v583_v58 }
 0x3b7   : > { %v366_v62 = vsel %vm142_vm8, %v584_v60, %v585_v59  ;;  %v367_v0 = vsel %vm142_vm8, %v585_v59, %v584_v60 }
 0x3b8   : > { %v374_v4 = vsel %vm775_vm3, %v361_v61, %v366_v62  ;;  %v375_v13 = vsel %vm787_vm5, %v360_v63, %v367_v0  ;;  %v368_v17 = vsel %vm771_vm2, %v366_v62, %v361_v61  ;;  %v369_v18 = vsel %vm783_vm4, %v367_v0, %v360_v63 }
 0x3b9   : > { %406 = vmatpush.msra.mxu2 %v374_v4  ;;  %426 = vmatpush.msra.mxu3 %v375_v13 }
 0x3bb   : > { %407 = vmatpush.msra.mxu2 %v306_v49  ;;  %427 = vmatpush.msra.mxu3 %v311_v52 }
 0x3bc   : > { %v588_v16 = vpop.permute.xlu1 %587 }
 0x3bd   : > { %v590_v19 = vunpack.i.h.bf16 %v588_v16  ;;  %v589_v20 = vunpack.i.l.bf16 %v588_v16  ;;  %408 = vmatpush.msra.mxu2 %v368_v17  ;;  %428 = vmatpush.msra.mxu3 %v369_v18 }
 0x3bf   : > { %v339_v21 = vsel %vm135_vm7, %v590_v19, %v589_v20  ;;  %v338_v23 = vsel %vm135_vm7, %v589_v20, %v590_v19 }
 0x3c0   : > { %v352_v26 = vsel %vm775_vm3, %v339_v21, %v344_v22  ;;  %v353_v27 = vsel %vm787_vm5, %v338_v23, %v345_v24  ;;  %v346_v31 = vsel %vm771_vm2, %v344_v22, %v339_v21  ;;  %v347_v32 = vsel %vm783_vm4, %v345_v24, %v338_v23 }
 0x3c1   : > { %409 = vmatpush.msra.mxu2 %v352_v26  ;;  %429 = vmatpush.msra.mxu3 %v353_v27 }
 0x3c3   : > { %410 = vmatpush.msra.mxu2 %v294_v38  ;;  %430 = vmatpush.msra.mxu3 %v295_v39  ;;  %v323_v38 = vsel %vm142_vm8, %v605_v28, %v604_v29 }
 0x3c4   : > { %v598_v30 = vpop.permute.xlu1 %597 }
 0x3c5   : > { %v600_v33 = vunpack.i.h.bf16 %v598_v30  ;;  %v599_v34 = vunpack.i.l.bf16 %v598_v30  ;;  %411 = vmatpush.msra.mxu2 %v346_v31  ;;  %431 = vmatpush.msra.mxu3 %v347_v32 }
 0x3c7   : > { %v317_v35 = vsel %vm135_vm7, %v600_v33, %v599_v34  ;;  %v316_v37 = vsel %vm135_vm7, %v599_v34, %v600_v33 }
 0x3c8   : > { %v330_v39 = vsel %vm775_vm3, %v317_v35, %v322_v36  ;;  %v331_v40 = vsel %vm787_vm5, %v316_v37, %v323_v38  ;;  %v324_v41 = vsel %vm771_vm2, %v322_v36, %v317_v35  ;;  %v325_v42 = vsel %vm783_vm4, %v323_v38, %v316_v37 }
 0x3c9   : > { %412 = vmatpush.msra.mxu2 %v330_v39  ;;  %432 = vmatpush.msra.mxu3 %v331_v40 }
 0x3cb   : > { %413 = vmatpush.msra.mxu2 %v308_v51  ;;  %433 = vmatpush.msra.mxu3 %v902_v47 }
 0x3cd   : > { %414 = vmatpush.msra.mxu2 %v324_v41  ;;  %434 = vmatpush.msra.mxu3 %v325_v42 }
 0x3ce   : > { %503 = vmatmul.msk.f32.vlgmr.msra.gmra.mxu2 %vm225_vm9, %v781_v8  ;;  %504 = vmatmul.msk.f32.vlgmr.msra.gmra.mxu3 %vm225_vm9, %v781_v8 }
 0x451   : > { %v416_v43 = vpop.f32.mrf.mxu2  ;;  %v436_v44 = vpop.f32.mrf.mxu3 }
 0x452   : > { %v439_v45 = vadd.f32 %v436_v44, %v416_v43 }
 0x454   : > { %440 = vadd.xlane.f32.xlu1 %v439_v45 }
 0x4c7   : > { %v441_v46 = vpop.xlane.xlu1 %440 }
 0x4c8   : > { %v442_v47 = vmul.f32 0.00390625, %v441_v46 }
 0x4ca   : > { %v443_v48 = vsub.f32 %v416_v43, %v442_v47  ;;  %v444_v49 = vsub.f32 %v436_v44, %v442_v47 }
 0x4cc   : > { %v445_v50 = vmul.f32 %v443_v48, %v443_v48  ;;  %v446_v51 = vmul.f32 %v444_v49, %v444_v49 }
 0x4ce   : > { %v447_v52 = vadd.f32 %v446_v51, %v445_v50 }
 0x4d0   : > { %448 = vadd.xlane.f32.xlu2 %v447_v52 }
 0x543   : > { %v449_v53 = vpop.xlane.xlu2 %448 }
 0x544   : > { %v450_v54 = vmul.f32 0.00390625, %v449_v53 }
 0x546   : > { %v451_v55 = vadd.f32 1e-05, %v450_v54 }
 0x548   : > { %608 = vrsqrt.f32 %v451_v55  ;;  %vm458_vm14 = vweird.f32 %v451_v55 }
 0x54e   : > { %v609_v56 = vpop.eup %608 }
 0x54f   : > { %v453_v57 = vmul.f32 %v609_v56, %v451_v55  ;;  %vm459_vm13 = vweird.f32 %v609_v56 }
 0x550   : > { %vm460_vm15 = vmor %vm458_vm14, %vm459_vm13 }
 0x551   : > { %v454_v58 = vmul.f32 %v609_v56, %v453_v57 }
 0x553   : > { %v455_v59 = vmul.f32 0.5, %v454_v58 }
 0x555   : > { %v456_v60 = vsub.f32 1.5, %v455_v59 }
 0x557   : > { %v457_v61 = vmul.f32 %v609_v56, %v456_v60 }
 0x559   : > { %v461_v62 = vsel %vm460_vm15, %v609_v56, %v457_v61 }
 0x55a   : > { %v462_v63 = vmul.f32 %v461_v62, %v443_v48  ;;  %v463_v0 = vmul.f32 %v461_v62, %v444_v49 }
 0x55b   :  { %99 = sbr.rel (!%p97_p0) target bundleno = 23 (0x17), region = 53 }
 0x55c   : > { %v464_v3 = vadd.f32 %v462_v63, %v799_v11  ;;  %v465_v4 = vadd.f32 %v463_v0, %v801_v12 }
 0x55e   : > { %468 = vst [vmem:[%s467_s6] sm:$0xff] %v464_v3 }
 0x55f   : > { %469 = vst [vmem:[%s467_s6 + $0x8] sm:$0xff] %v465_v4 }
 0x560   :  { %482 = dma.vmem_to_hbm [thread:$0]  %s475_s11, 1024, %s477_s9, [#allocation5], %s722_s22, %s722_s22, %s723_s23  }
 0x561   :  { %714 = dma.done.wait [#allocation5], 1024  }
 0x562   :  { %715 = vsyncadd [#allocation5], 4294966272 }
 0x563   :  { %487 = vsyncpa [#allocation4], 1 }
 0x564   :  { %488 = vsyncpa [#allocation7], 1 }
 0x565   :  { %489 = vsyncpa [#allocation5], 1 }

</bundles_post_ra>
